<compile_context>
chip_gen: v7x
topology: tpu7x:2x2x1
jax: 0.10.0
libtpu: 0.0.40
codegen_flags: <defaults>
</compile_context>

<pallas_src>
import functools

import jax
import jax.numpy as jnp
from jax.experimental import pallas as pl
from jax.experimental.pallas import tpu as pltpu


def _round_up(x, m):
    return (x + m - 1) // m * m


def _embed_kernel(x_ref, w_ref, pb_ref, o_ref):
    # x_ref : (1, n_tile, K_pad)  bf16 patch tile
    # w_ref : (K_pad, E_pad)      bf16 weight (same block every step -> resident)
    # pb_ref: (n_tile, E_pad)     f32  position embedding + conv bias
    # o_ref : (1, n_tile, E_pad)  f32
    acc = jnp.dot(x_ref[0], w_ref[...], preferred_element_type=jnp.float32)
    o_ref[0] = (acc + pb_ref[...]).astype(o_ref.dtype)


def prepare_siglip_embedding_params(conv_w, conv_b, pos_emb):
    """One-time (outside the hot path) parameter preparation.

    conv_w : (E, C, P, P)  PyTorch Conv2d weight layout
    conv_b : (E,)
    pos_emb: (N, E)        nn.Embedding table (position_ids = arange(N))
    Returns:
      w_kE    : (K_pad, E_pad) bf16  pre-transposed, K/E zero-padded to 128
      pos_bias: (N, E_pad)     f32   pos_emb + conv_b, E zero-padded
    """
    E, C, P, _ = conv_w.shape
    K = C * P * P
    K_pad = _round_up(K, 128)
    E_pad = _round_up(E, 128)
    w = conv_w.reshape(E, K).T.astype(jnp.bfloat16)                    # (K, E)
    w = jnp.pad(w, ((0, K_pad - K), (0, E_pad - E)))
    pos_bias = (pos_emb + conv_b[None, :]).astype(jnp.float32)         # (N, E)
    pos_bias = jnp.pad(pos_bias, ((0, 0), (0, E_pad - E)))
    return w, pos_bias


@functools.partial(jax.jit, static_argnames=("patch_size", "embed_dim", "n_tile"))
def siglip_vision_embeddings(pixel_values, w_kE, pos_bias, *, patch_size,
                             embed_dim, n_tile=256):
    """pixel_values: (B, C, H, W) float32 (NCHW).  Returns (B, N, E) float32."""
    B, C, H, W = pixel_values.shape
    P = patch_size
    nh, nw = H // P, W // P
    N = nh * nw
    K = C * P * P
    K_pad, E_pad = w_kE.shape

    # Patchify (fused by XLA with the bf16 cast + K zero-pad inside this jit):
    # (B, C, H, W) -> (B, N, K), per-patch flatten order (C, ph, pw) matching
    # the Conv2d weight reshape in prepare_siglip_embedding_params.
    patches = (
        pixel_values.reshape(B, C, nh, P, nw, P)
        .transpose(0, 2, 4, 1, 3, 5)
        .reshape(B, N, K)
        .astype(jnp.bfloat16)
    )
    if K_pad != K:
        patches = jnp.pad(patches, ((0, 0), (0, 0), (0, K_pad - K)))

    n_tile = min(n_tile, _round_up(N, 8))
    n_steps = pl.cdiv(N, n_tile)

    out = pl.pallas_call(
        _embed_kernel,
        out_shape=jax.ShapeDtypeStruct((B, N, E_pad), jnp.float32),
        grid=(B, n_steps),
        in_specs=[
            pl.BlockSpec((1, n_tile, K_pad), lambda b, n: (b, n, 0)),
            pl.BlockSpec((K_pad, E_pad), lambda b, n: (0, 0)),
            pl.BlockSpec((n_tile, E_pad), lambda b, n: (n, 0)),
        ],
        out_specs=pl.BlockSpec((1, n_tile, E_pad), lambda b, n: (b, n, 0)),
        compiler_params=pltpu.CompilerParams(
            dimension_semantics=("parallel", "parallel"),
            vmem_limit_bytes=48 * 1024 * 1024,  # explicit headroom, < v7x physical
        ),
    )(patches, w_kE, pos_bias)

    return out[..., :embed_dim]


if __name__ == "__main__":
    # Small synthetic config consistent with the module:
    # hidden_size=32, num_channels=3, image_size=32, patch_size=8 -> N=16
    B, C, H, W = 2, 3, 32, 32
    P = 8
    E = 32
    N = (H // P) * (W // P)

    key = jax.random.PRNGKey(0)
    k_x, k_w, k_b, k_pos = jax.random.split(key, 4)

    pixel_values = jax.random.normal(k_x, (B, C, H, W), dtype=jnp.float32)
    conv_w = 0.02 * jax.random.normal(k_w, (E, C, P, P), dtype=jnp.float32)  # Conv2d weight
    conv_b = 0.02 * jax.random.normal(k_b, (E,), dtype=jnp.float32)          # Conv2d bias
    pos_emb = 0.02 * jax.random.normal(k_pos, (N, E), dtype=jnp.float32)     # Embedding table

    # One-time param prep (weight transpose / pad, bias folded into positions).
    w_kE, pos_bias = prepare_siglip_embedding_params(conv_w, conv_b, pos_emb)

    # Small n_tile so the toy shape exercises the tiled-N grid (2 steps / batch).
    out = siglip_vision_embeddings(pixel_values, w_kE, pos_bias,
                                   patch_size=P, embed_dim=E, n_tile=8)
    out = jax.block_until_ready(out)

    # Reference check against XLA conv (same semantics as nn.Conv2d valid/stride=P).
    ref = jax.lax.conv_general_dilated(
        pixel_values, conv_w, window_strides=(P, P), padding="VALID",
        dimension_numbers=("NCHW", "OIHW", "NCHW"),
    ) + conv_b[None, :, None, None]
    ref = ref.reshape(B, E, N).transpose(0, 2, 1) + pos_emb[None]

    assert out.shape == (B, N, E), out.shape
    # bf16 matmul inputs -> loosened tolerance vs. the f32 reference.
    assert jnp.allclose(out, ref, atol=2e-2, rtol=2e-2), \
        float(jnp.max(jnp.abs(out - ref)))

    print("KERNEL_OK")
</pallas_src>

<mosaic_0001>
module attributes {stable_mosaic.version = 11 : i64} {
  func.func @_embed_kernel(%arg0: i32, %arg1: i32, %arg2: memref<1x8x256xbf16, #tpu.memory_space<vmem>>, %arg3: memref<256x128xbf16, #tpu.memory_space<vmem>>, %arg4: memref<8x128xf32, #tpu.memory_space<vmem>>, %arg5: memref<1x8x128xf32, #tpu.memory_space<vmem>>) attributes {dimension_semantics = [#tpu.dimension_semantics<parallel>, #tpu.dimension_semantics<parallel>], iteration_bounds = array<i64: 2, 2>, scalar_prefetch = 0 : i64, scratch_operands = 0 : i64, tpu.core_type = #tpu.core_type<tc>, window_params = [{transform_indices = @transform_0, window_bounds = array<i64: 1, 8, 256>}, {pipeline_mode = #tpu.pipeline_mode<synchronous>, transform_indices = @transform_1, window_bounds = array<i64: 256, 128>}, {transform_indices = @transform_2, window_bounds = array<i64: 8, 128>}, {transform_indices = @transform_3, window_bounds = array<i64: 1, 8, 128>}]} {
    %c0 = arith.constant 0 : index
    %c0_0 = arith.constant 0 : index
    %c0_1 = arith.constant 0 : index
    %0 = vector.load %arg2[%c0, %c0_0, %c0_1] : memref<1x8x256xbf16, #tpu.memory_space<vmem>>, vector<1x8x256xbf16>
    %1 = vector.shape_cast %0 : vector<1x8x256xbf16> to vector<8x256xbf16>
    %c0_2 = arith.constant 0 : index
    %c0_3 = arith.constant 0 : index
    %2 = vector.load %arg3[%c0_2, %c0_3] : memref<256x128xbf16, #tpu.memory_space<vmem>>, vector<256x128xbf16>
    %cst = arith.constant dense<0.000000e+00> : vector<8x128xf32>
    %3 = tpu.matmul %1, %2, %cst {dimension_numbers = #tpu.dot_dimension_numbers<[1], [0], [0], [1], [0, 0, 1, 1], [], []>} : vector<8x256xbf16>, vector<256x128xbf16>, vector<8x128xf32> -> vector<8x128xf32>
    %c0_4 = arith.constant 0 : index
    %c0_5 = arith.constant 0 : index
    %4 = vector.load %arg4[%c0_4, %c0_5] : memref<8x128xf32, #tpu.memory_space<vmem>>, vector<8x128xf32>
    %5 = arith.addf %3, %4 : vector<8x128xf32>
    %c0_6 = arith.constant 0 : index
    %c0_7 = arith.constant 0 : index
    %c0_8 = arith.constant 0 : index
    %6 = vector.load %arg5[%c0_6, %c0_7, %c0_8] : memref<1x8x128xf32, #tpu.memory_space<vmem>>, vector<1x8x128xf32>
    %7 = vector.shape_cast %6 : vector<1x8x128xf32> to vector<8x128xf32>
    %8 = vector.shape_cast %5 : vector<8x128xf32> to vector<1x8x128xf32>
    tpu.vector_store %arg5[%c0_6, %c0_7, %c0_8], %8 {strides = array<i32>} : memref<1x8x128xf32, #tpu.memory_space<vmem>>, vector<1x8x128xf32>,
    return
  }
  func.func @transform_0(%arg0: i32, %arg1: i32) -> (i32, i32, i32) {
    %c0_i32 = arith.constant 0 : i32
    %c0_i32_0 = arith.constant 0 : i32
    return %arg0, %arg1, %c0_i32 : i32, i32, i32
  }
  func.func @transform_1(%arg0: i32, %arg1: i32) -> (i32, i32) {
    %c0_i32 = arith.constant 0 : i32
    %c0_i32_0 = arith.constant 0 : i32
    %c0_i32_1 = arith.constant 0 : i32
    return %c0_i32, %c0_i32_0 : i32, i32
  }
  func.func @transform_2(%arg0: i32, %arg1: i32) -> (i32, i32) {
    %c0_i32 = arith.constant 0 : i32
    %c0_i32_0 = arith.constant 0 : i32
    return %arg1, %c0_i32 : i32, i32
  }
  func.func @transform_3(%arg0: i32, %arg1: i32) -> (i32, i32, i32) {
    %c0_i32 = arith.constant 0 : i32
    %c0_i32_0 = arith.constant 0 : i32
    return %arg0, %arg1, %c0_i32 : i32, i32, i32
  }
}

</mosaic_0001>

<bundles_post_ra>
// kernel: siglip_vision_embeddings.1
= control target key start
LH: loop header
LB: loop body
LE: loop exit
PB: predicated region body
PF: predicated region fallthrough
CT: control target
= control target key end

     0   :  { %8 = vsyncpa [#allocation3], 0  ;;  %s955_s0 = inlined_call_operand.vmem [shape: bf16[2,16,256], index: 0, kind: input, shape index: {}]   ;;  %s956_s1 = inlined_call_operand.vmem [shape: bf16[256,128], index: 1, kind: input, shape index: {}]   ;;  %s957_s2 = inlined_call_operand.vmem [shape: f32[16,128], index: 2, kind: input, shape index: {}]   ;;  %s958_s3 = inlined_call_operand.hbm [shape: f32[2,16,128], index: 3, kind: output, shape index: {}]  }
   0x1   :  { %10 = vsyncpa [#allocation3 + $0x1], 0  ;;  %s763_s12 = smov 0   ;;  %s765_s13 = smov 0  }
   0x2   :  { %s767_s14 = smov 0   ;;  %s769_s15 = smov 0  }
   0x3   :  { %s771_s16 = smov 0   ;;  %s773_s17 = smov 0  }
   0x4   :  { %s775_s18 = smov 0   ;;  %s777_s19 = smov 0  }
   0x5 LB: > { %s502_s20 = sadd.s32 4294967295, %s740_s19   ;;  %s503_s21 = sadd.s32 4294967294, %s740_s19   ;;  %s740_s19 = sphi %s777_s19, %s16_s19   ;;  %s736_s18 = sphi %s775_s18, %s967_s18   ;;  %s732_s17 = sphi %s773_s17, %s966_s17   ;;  %s728_s16 = sphi %s771_s16, %s965_s16   ;;  %s724_s15 = sphi %s769_s15, %s964_s15   ;;  %s720_s14 = sphi %s767_s14, %s963_s14   ;;  %s716_s13 = sphi %s765_s13, %s962_s13   ;;  %s712_s12 = sphi %s763_s12, %s961_s12  }
   0x6   : > { %s25_s22 = sadd.s32 1, %s732_s17  ;;  %s28_s23 = sadd.s32 1, %s736_s18 }
   0x7   : > { %p26_p0 = scmp.ge.s32.totalorder %s25_s22, 2  ;;  %p122_p1 = scmp.ne.s32.totalorder %s720_s14, %s716_s13 }
   0x8   : > { %p123_p2 = scmp.eq.s32.totalorder %s502_s20, 3  ;;  %p128_p5 = scmp.ne.s32.totalorder %s716_s13, %s712_s12 }
   0x9   : > { %s969_s22 = smov (%p26_p0, %s25_s22), 0  ;;  %s971_s23 = smov (!%p26_p0, %s28_s23), %s736_s18 }
   0xa   : > { %s108_s24 = ssub.s32 %s732_s17, %s969_s22  ;;  %p814_p3 = por %p123_p2, %p122_p1 }
   0xb   : > { %p30_p4 = scmp.ge.s32.totalorder %s971_s23, 2  ;;  %p129_p6 = scmp.eq.s32.totalorder %s503_s21, 3 }
   0xc   : > { %p506_p7 = scmp.ge.s32.totalorder %s740_s19, 1  ;;  %p169_p9 = scmp.lt.s32.totalorder %s740_s19, 5 }
   0xd   : > { %s973_s23 = smov (%p30_p4, %s971_s23), 0  ;;  %p823_p8 = por %p129_p6, %p128_p5 }
   0xe   : > { %s107_s27 = ssub.s32 %s736_s18, %s973_s23  ;;  %s112_s28 = sadd.s32 1, %s720_s14 }
   0xf   : > { %s109_s29 = sor.u32 %s108_s24, %s107_s27  ;;  %p170_p10 = pnand %p506_p7, %p169_p9 }
  0x10   : > { %p110_p11 = scmp.eq.s32.totalorder %s109_s29, 0  ;;  %v628_v0 = vld [vmem:[%s956_s1 + $0x40] sm:$0xff] (!%p170_p10)   ;;  %p201_p12 = scmp.lt.s32.totalorder (!%p170_p10), %s728_s16, 1  ;;  %v630_v2 = vld [vmem:[%s956_s1 + $0x48] sm:$0xff] (!%p170_p10)   ;;  %v632_v4 = vld [vmem:[%s956_s1 + $0x50] sm:$0xff] (!%p170_p10)  }
  0x11   : > { %173 = sbr.rel (%p170_p10) target bundleno = 281 (0x119), region = 32  ;;  %v629_v1 = vld [vmem:[%s956_s1] sm:$0xff] (!%p170_p10)   ;;  %p203_p13 = scmp.lt.s32.totalorder (!%p170_p10), %s724_s15, 1  ;;  %535 = vmatprep.subr.bf16.mxu0 (!%p170_p10), %v628_v0  ;;  %v631_v3 = vld [vmem:[%s956_s1 + $0x8] sm:$0xff] (!%p170_p10)   ;;  %v633_v5 = vld [vmem:[%s956_s1 + $0x10] sm:$0xff] (!%p170_p10)  }
  0x12   : > { %s832_s30 = scalar_select %p110_p11, %s720_s14, %s112_s28  }
  0x13   : > { %536 = vmatpush3.bf16.msra.mxu0 (!%p170_p10), %v629_v1  ;;  %v634_v6 = vld [vmem:[%s956_s1 + $0x58] sm:$0xff] (!%p170_p10)   ;;  %v636_v8 = vld [vmem:[%s956_s1 + $0x60] sm:$0xff] (!%p170_p10)   ;;  %v638_v10 = vld [vmem:[%s956_s1 + $0x68] sm:$0xff] (!%p170_p10)   ;;  %s198_s5 = sand.u32 (!%p170_p10), 1, %s716_s13   ;;  %s531_s8 = sshll.u32 (!%p170_p10), %s728_s16, 1 }
  0x14   : > { %537 = vmatprep.subr.bf16.mxu0 (!%p170_p10), %v630_v2  ;;  %v635_v7 = vld [vmem:[%s956_s1 + $0x18] sm:$0xff] (!%p170_p10)   ;;  %v637_v9 = vld [vmem:[%s956_s1 + $0x20] sm:$0xff] (!%p170_p10)   ;;  %v639_v13 = vld [vmem:[%s956_s1 + $0x28] sm:$0xff] (!%p170_p10)   ;;  %s507_s7 = sshll.u32 (!%p170_p10), %s198_s5, 3 }
  0x15   : > { %v640_v14 = vld [vmem:[%s956_s1 + $0x70] sm:$0xff] (!%p170_p10)   ;;  %v642_v16 = vld [vmem:[%s956_s1 + $0x78] sm:$0xff] (!%p170_p10)   ;;  %s200_s27 = scalar_lea.vmem (!%p170_p10), [#allocation2], %s507_s7 }
  0x16   : > { %v641_v15 = vld [vmem:[%s956_s1 + $0x30] sm:$0xff] (!%p170_p10)   ;;  %v643_v17 = vld [vmem:[%s956_s1 + $0x38] sm:$0xff] (!%p170_p10)   ;;  %s409_s4 = sshll.u32 (!%p170_p10), %s200_s27, 4  ;;  %s904_s4 = int_to_ptr.vmem [resolvable:$true] %s409_s4 }
  0x17   : > { %538 = vmatpush3.bf16.msra.mxu0 (!%p170_p10), %v631_v3 }
  0x18   : > { %s202_s10 = scalar_select %p201_p12, %s728_s16, 1  ;;  %539 = vmatprep.subr.bf16.mxu0 %v632_v4 }
  0x19   : > { %s850_s21 = scalar_select %p203_p13, %s724_s15, 1 }
  0x1a   : > { %s509_s28 = sshll.u32 %s202_s10, 2  ;;  %s405_s10 = sadd.s32 %s724_s15, %s531_s8 }
  0x1b   : > { %s508_s29 = sshll.u32 %s850_s21, 1  ;;  %540 = vmatpush3.bf16.msra.mxu0 %v633_v5  ;;  %s532_s24 = sshll.u32 %s405_s10, 7 }
  0x1c   : > { %s207_s6 = sadd.s32 %s509_s28, %s508_s29  ;;  %541 = vmatprep.subr.bf16.mxu0 %v634_v6  ;;  %s902_s16 = scalar_lea.hbm %s958_s3, %s532_s24 }
  0x1d   : > { %s510_s9 = sshll.u32 %s207_s6, 2  ;;  %s511_s6 = sshll.u32 %s850_s21, 3 }
  0x1e   : > { %s209_s28 = scalar_lea.vmem %s955_s0, %s510_s9  ;;  %s213_s20 = scalar_lea.vmem %s957_s2, %s511_s6 }
  0x1f   : > { %542 = vmatpush3.bf16.msra.mxu0 %v635_v7  ;;  %v215_v11 = vld [vmem:[%s209_s28] sm:$0xff]  ;;  %s394_s15 = scalar_lea.sflag [#allocation3], %s198_s5  ;;  %s646_s29 = scalar_lea.vmem %s904_s4, 128 }
  0x20   : > { %543 = vmatprep.subr.bf16.mxu0 %v636_v8  ;;  %v513_v12 = vcombine.high %v215_v11, %v215_v11  ;;  %v512_v18 = vcombine.low %v215_v11, %v215_v11  ;;  %v248_v20 = vld [vmem:[%s213_s20] sm:$0xff]  ;;  %p647_p0 = scmp.ne.s32.totalorder %s904_s4, %s646_s29  ;;  %s742_s6 = smov [#allocation2]  }
  0x21   : > { %s650_s7 = sshll.u32 %s742_s6, 4  ;;  %s651_s7 = int_to_ptr.vmem [resolvable:$false] %s650_s7 }
  0x22   : > { %384 = vmatprep.mubr.bf16.mxu0 %v513_v12  ;;  %p648_p1 = pnand %p647_p0, %p814_p3  ;;  %s652_s8 = scalar_lea.vmem %s651_s7, 256 }
  0x23   : > { %544 = vmatpush3.bf16.msra.mxu0 %v637_v9  ;;  %p653_p4 = scmp.lt.s32.totalorder %s904_s4, %s651_s7  ;;  %p654_p5 = scmp.lt.s32.totalorder %s652_s8, %s646_s29 }
  0x24   : > { %545 = vmatprep.subr.bf16.mxu0 %v638_v10  ;;  %p649_p2 = pneg %p648_p1 }
  0x25   : > { %p655_p6 = por %p654_p5, %p653_p4 }
  0x27   : > { %546 = vmatpush3.bf16.msra.mxu0 %v639_v13  ;;  %p656_p7 = pnand %p655_p6, %p649_p2 }
  0x28   : > { %547 = vmatprep.subr.bf16.mxu0 %v640_v14 }
  0x2b   : > { %548 = vmatpush3.bf16.msra.mxu0 %v641_v15 }
  0x2c   : > { %549 = vmatprep.subr.bf16.mxu0 %v642_v16 }
  0x2f   : > { %550 = vmatpush3.bf16.msra.mxu0 %v643_v17 }
  0x32   : > { %385 = vmatmul.mubr.bf16.vlgmr.msra.gmra.mrb[0].mxu0 %v512_v18 }
 0x105   : > { %v551_v19 = vpop.f32.mrb[0].mxu0 }
 0x106   : > { %v552_v21 = vpop.f32.mrb[1].mxu0 }
 0x107   : > { %v553_v22 = vadd.f32 %v552_v21, %v551_v19  ;;  %v554_v23 = vpop.f32.mrb[2].mxu0 }
 0x108   : > { %v555_v24 = vpop.f32.mrb[3].mxu0 }
 0x109   : > { %v387_v25 = vadd.f32 %v553_v22, %v248_v20 }
 0x10b   : > { %392 = vst [vmem:[%s200_s27] sm:$0xff] %v387_v25 }
 0x10c   : > { %659 = shalt.err (!%p656_p7)
}
 0x10d   : > { %s660_s5 = scalar_lea.hbm %s902_s16, 128  ;;  %s664_s20 = scalar_lea.hbm %s958_s3, 512 }
 0x10e   : > { %p661_p9 = scmp.ne.s32.totalorder %s902_s16, %s660_s5  ;;  %p665_p12 = scmp.lt.u32.totalorder %s902_s16, %s958_s3 }
 0x10f   : > { %p666_p13 = scmp.lt.u32.totalorder %s664_s20, %s660_s5  ;;  %p668_p1 = scmp.lt.u32.totalorder %s660_s5, %s902_s16 }
 0x110   : > { %p662_p10 = pnand %p661_p9, %p814_p3 }
 0x111   : > { %p667_p0 = por %p666_p13, %p665_p12 }
 0x112   : > { %p663_p11 = pneg %p662_p10 }
 0x113   : > { %p669_p2 = por %p668_p1, %p667_p0 }
 0x115   : > { %p670_p4 = pnand %p669_p2, %p663_p11 }
 0x117   : > { %673 = shalt.err (!%p670_p4)
}
 0x118   : > { %557 = dma.vmem_to_hbm [thread:$0]  (%p814_p3), %s904_s4, 128, %s902_s16, %s394_s15  }
 0x119 PF: > { %p563_p5 = scmp.ge.s32.totalorder %s740_s19, 2  ;;  %s421_s27 = sand.u32 1, %s712_s12  }
 0x11a   : > { %s422_s28 = scalar_lea.sflag [#allocation3], %s421_s27 }
 0x11b   : > { %p560_p6 = pnand %p563_p5, %p823_p8 }
 0x11d   : > { %707 = dma.done.wait (!%p560_p6), %s422_s28, 128  }
 0x11e   : > { %709 = vsyncadd (!%p560_p6), %s422_s28, 4294967168  ;;  %s16_s19 = sadd.s32 1, %s740_s19   ;;  %s961_s12 = smov %s716_s13 }
 0x11f   : > { %p13_p7 = scmp.ge.s32.totalorder %s16_s19, 6   ;;  %s962_s13 = smov %s720_s14 }
 0x120   : > { %s963_s14 = smov %s832_s30  ;;  %s964_s15 = smov %s732_s17 }
 0x121   : > { %s965_s16 = smov %s736_s18  ;;  %s966_s17 = smov %s969_s22 }
 0x122   : > { %s967_s18 = smov %s973_s23  ;;  %15 = sbr.rel (!%p13_p7) target bundleno = 5 (0x5), region = 70 }
 0x129   :  { %427 = vsyncpa [#allocation3], 1 }
 0x12a   :  { %429 = vsyncpa [#allocation3 + $0x1], 1 }

</bundles_post_ra>
